<compile_context>
chip_gen: v5e
topology: v5e:2x2
jax: 0.10.0
libtpu: 0.0.40
codegen_flags: <defaults>
</compile_context>

<pallas_src>
import jax
import jax.numpy as jnp
from jax.experimental import pallas as pl
from jax.experimental.pallas import tpu as pltpu


# ------------------------------ helpers -------------------------------------


def _round_up(x, m):
    return ((x + m - 1) // m) * m


def _cdiv(a, b):
    return (a + b - 1) // b


def _vmem_capacity_bytes():
    """Physical VMEM per TensorCore; conservative fallback if unavailable."""
    try:
        return int(pltpu.get_tpu_info().vmem_capacity_bytes)
    except Exception:
        return 64 * 1024 * 1024


def _resident_spec(block_shape, index_map):
    """BlockSpec for grid-invariant operands: request a single VMEM buffer
    (no double-buffering) when the installed JAX supports pipeline_mode."""
    buffered = getattr(pl, "Buffered", None)
    if buffered is not None:
        try:
            return pl.BlockSpec(block_shape, index_map, pipeline_mode=buffered(1))
        except TypeError:
            pass
    return pl.BlockSpec(block_shape, index_map)


# ------------------------------ kernels -------------------------------------


def _fcnn_kernel(x_ref, w1_ref, b1_ref, w2_ref, b2_ref, o_ref):
    """Resident-weights path: whole hidden dim in one shot."""
    # fc1 on the MXU: bf16 operands, f32 accumulation (x cast in-kernel).
    x = x_ref[...].astype(w1_ref.dtype)
    h = jnp.dot(x, w1_ref[...], preferred_element_type=jnp.float32)
    # Bias + ReLU in f32 on the VPU (correct on v5e too: no bf16 VPU there).
    h = jnp.maximum(h + b1_ref[...], 0.0)
    # fc2 on the MXU.
    out = jnp.dot(h.astype(w2_ref.dtype), w2_ref[...],
                  preferred_element_type=jnp.float32)
    o_ref[...] = (out + b2_ref[...]).astype(o_ref.dtype)


def _fcnn_hid_tiled_kernel(x_ref, w1_ref, b1_ref, w2_ref, b2_ref, o_ref,
                           acc_ref):
    """Hidden-dim tiled path: accumulate partial fc2 outputs over HID tiles."""
    k = pl.program_id(1)

    @pl.when(k == 0)
    def _():
        acc_ref[...] = jnp.zeros_like(acc_ref)

    x = x_ref[...].astype(w1_ref.dtype)
    h = jnp.dot(x, w1_ref[...], preferred_element_type=jnp.float32)
    h = jnp.maximum(h + b1_ref[...], 0.0)   # ReLU is per-hidden-column: tiling is exact
    acc_ref[...] += jnp.dot(h.astype(w2_ref.dtype), w2_ref[...],
                            preferred_element_type=jnp.float32)

    @pl.when(k == pl.num_programs(1) - 1)
    def _():
        o_ref[...] = (acc_ref[...] + b2_ref[...]).astype(o_ref.dtype)


# ------------------------------ wrapper -------------------------------------


def prepare_fcnn_params(w1, b1, w2, b2, *, lane=128):
    """One-time prep (hoisted out of the per-call path): cast weights to bf16
    and zero-pad the lane (feature) dims to multiples of 128.

    w1: (in, hidden), b1: (hidden,), w2: (hidden, out), b2: (out,).
    Zero padding keeps the math exact (padded rows/cols contribute 0)."""
    in_size, hidden = w1.shape
    out_size = w2.shape[1]
    HID_P = _round_up(hidden, lane)
    OUT_P = _round_up(out_size, lane)
    bf16 = jnp.bfloat16
    w1p = jnp.zeros((in_size, HID_P), bf16).at[:, :hidden].set(w1.astype(bf16))
    w2p = jnp.zeros((HID_P, OUT_P), bf16).at[:hidden, :out_size].set(w2.astype(bf16))
    b1p = jnp.zeros((1, HID_P), jnp.float32).at[0, :hidden].set(
        b1.astype(jnp.float32))
    b2p = jnp.zeros((1, OUT_P), jnp.float32).at[0, :out_size].set(
        b2.astype(jnp.float32))
    return dict(w1=w1p, b1=b1p, w2=w2p, b2=b2p,
                in_size=in_size, hidden=hidden, out_size=out_size,
                HID_P=HID_P, OUT_P=OUT_P)


def fcnn_forward(x, params, *, batch_tile=256, hid_tile=None):
    """Forward pass of FCNN.  x: (B, in_size); params from prepare_fcnn_params."""
    w1p, b1p, w2p, b2p = params["w1"], params["b1"], params["w2"], params["b2"]
    in_size, out_size = params["in_size"], params["out_size"]
    HID_P, OUT_P = params["HID_P"], params["OUT_P"]

    B = x.shape[0]
    assert x.shape[1] == in_size, "input feature dim mismatch"

    out_dtype = x.dtype
    x_bytes = x.dtype.itemsize
    out_bytes = jnp.dtype(out_dtype).itemsize

    cap = _vmem_capacity_bytes()
    usable = int(cap * 0.8)

    # Decide whether weights stay fully VMEM-resident or the hidden dim must
    # be tiled (mainly relevant on v7x / very large hidden sizes).
    resident_w_bytes = (in_size * HID_P + HID_P * OUT_P) * 2 + (HID_P + OUT_P) * 4
    use_hid_tiling = hid_tile is not None or resident_w_bytes > int(cap * 0.4)
    if use_hid_tiling:
        if hid_tile is None:
            hid_tile = next(t for t in (512, 256, 128) if HID_P % t == 0)
        hid_tile = min(hid_tile, HID_P)
        assert HID_P % hid_tile == 0 and hid_tile % 128 == 0

    def budget(tb):
        """VMEM bytes: tiles + weights + intermediates (h f32, bf16 casts,
        f32 pre-store temp) + accumulator."""
        hid = hid_tile if use_hid_tiling else HID_P
        tiles = 2 * tb * in_size * x_bytes + 2 * tb * OUT_P * out_bytes
        if use_hid_tiling:
            # W1/b1/W2 are double-buffered along the hid axis; b2 resident.
            weights = 2 * ((in_size * hid + hid * OUT_P) * 2 + hid * 4) + OUT_P * 4
            acc = tb * OUT_P * 4
        else:
            weights = resident_w_bytes          # single-buffered residents
            acc = 0
        inter = tb * in_size * 2 + tb * hid * (4 + 2) + tb * OUT_P * 4
        return tiles + weights + inter + acc

    # Batch tile: multiple of 8, shrunk until the VMEM budget fits, and sized
    # so the batch grid has >= 2 steps whenever B allows it (v7x megacore).
    B8 = _round_up(B, 8)
    TB = min(max(8, _round_up(batch_tile, 8)), B8)
    while TB > 8 and budget(TB) > usable:
        TB = max(8, _round_up(TB // 2, 8))
    if B8 >= 16 and _cdiv(B8, TB) < 2:
        TB = _round_up(_cdiv(B8, 2), 8)
    B_P = _round_up(B, TB)

    vmem_limit = min(max(int(budget(TB) * 1.25), 32 * 1024 * 1024),
                     int(cap * 0.85))

    # Only the batch dim of x is ever padded (feature dim stays unpadded).
    xp = x if B_P == B else jnp.pad(x, ((0, B_P - B), (0, 0)))

    out_shape = jax.ShapeDtypeStruct((B_P, OUT_P), out_dtype)

    if not use_hid_tiling:
        out_padded = pl.pallas_call(
            _fcnn_kernel,
            out_shape=out_shape,
            grid=(B_P // TB,),
            in_specs=[
                pl.BlockSpec((TB, in_size), lambda i: (i, 0)),        # x: streamed
                _resident_spec((in_size, HID_P), lambda i: (0, 0)),   # W1 resident
                _resident_spec((1, HID_P), lambda i: (0, 0)),         # b1 resident
                _resident_spec((HID_P, OUT_P), lambda i: (0, 0)),     # W2 resident
                _resident_spec((1, OUT_P), lambda i: (0, 0)),         # b2 resident
            ],
            out_specs=pl.BlockSpec((TB, OUT_P), lambda i: (i, 0)),
            compiler_params=pltpu.CompilerParams(
                dimension_semantics=("parallel",),
                vmem_limit_bytes=vmem_limit,
            ),
        )(xp, w1p, b1p, w2p, b2p)
    else:
        out_padded = pl.pallas_call(
            _fcnn_hid_tiled_kernel,
            out_shape=out_shape,
            grid=(B_P // TB, HID_P // hid_tile),
            in_specs=[
                pl.BlockSpec((TB, in_size), lambda i, k: (i, 0)),
                pl.BlockSpec((in_size, hid_tile), lambda i, k: (0, k)),
                pl.BlockSpec((1, hid_tile), lambda i, k: (0, k)),
                pl.BlockSpec((hid_tile, OUT_P), lambda i, k: (k, 0)),
                _resident_spec((1, OUT_P), lambda i, k: (0, 0)),
            ],
            out_specs=pl.BlockSpec((TB, OUT_P), lambda i, k: (i, 0)),
            scratch_shapes=[pltpu.VMEM((TB, OUT_P), jnp.float32)],
            compiler_params=pltpu.CompilerParams(
                dimension_semantics=("parallel", "arbitrary"),
                vmem_limit_bytes=vmem_limit,
            ),
        )(xp, w1p, b1p, w2p, b2p)

    # Slice the lane-dense padded slab back to the logical output shape.
    return out_padded[:B, :out_size]


def init_linear_params(key, in_features, out_features, dtype=jnp.float32):
    """PyTorch nn.Linear default init: U(-1/sqrt(fan_in), 1/sqrt(fan_in))."""
    kw, kb = jax.random.split(key)
    bound = 1.0 / jnp.sqrt(jnp.array(in_features, dtype=dtype))
    # Stored directly in (in_features, out_features) layout (i.e. W^T of torch).
    w = jax.random.uniform(kw, (in_features, out_features), dtype,
                           minval=-bound, maxval=bound)
    b = jax.random.uniform(kb, (out_features,), dtype,
                           minval=-bound, maxval=bound)
    return w, b


if __name__ == "__main__":
    # --- Test 1: module shapes, resident-weights path ------------------------
    batch, input_size, hidden_size, output_size = 8, 16, 32, 8
    key = jax.random.PRNGKey(0)
    kx, k1, k2 = jax.random.split(key, 3)

    x = jax.random.normal(kx, (batch, input_size), jnp.float32)
    w1, b1 = init_linear_params(k1, input_size, hidden_size)
    w2, b2 = init_linear_params(k2, hidden_size, output_size)

    params = prepare_fcnn_params(w1, b1, w2, b2)   # one-time padding/cast
    out = jax.block_until_ready(fcnn_forward(x, params))

    # Pure-JAX f32 reference; tolerance loosened because the kernel uses bf16
    # MXU operands (with f32 accumulation).
    ref = jnp.maximum(x @ w1 + b1, 0.0) @ w2 + b2
    assert out.shape == (batch, output_size)
    assert out.dtype == x.dtype
    assert jnp.allclose(out, ref, atol=5e-2, rtol=5e-2), (
        f"max abs err = {jnp.max(jnp.abs(out - ref))}")

    # --- Test 2: exercise the HID-tiled accumulator fallback path ------------
    batch2, in2, hid2, out2 = 16, 64, 256, 64
    kx2, k3, k4 = jax.random.split(jax.random.PRNGKey(1), 3)
    x2 = jax.random.normal(kx2, (batch2, in2), jnp.float32)
    w1b, b1b = init_linear_params(k3, in2, hid2)
    w2b, b2b = init_linear_params(k4, hid2, out2)
    params2 = prepare_fcnn_params(w1b, b1b, w2b, b2b)
    out_t = jax.block_until_ready(
        fcnn_forward(x2, params2, batch_tile=8, hid_tile=128))
    ref2 = jnp.maximum(x2 @ w1b + b1b, 0.0) @ w2b + b2b
    assert out_t.shape == (batch2, out2)
    assert jnp.allclose(out_t, ref2, atol=5e-2, rtol=5e-2), (
        f"max abs err = {jnp.max(jnp.abs(out_t - ref2))}")

    print("KERNEL_OK")
</pallas_src>

<mosaic_0001>
module attributes {stable_mosaic.version = 11 : i64} {
  func.func @_fcnn_kernel(%arg0: i32, %arg1: memref<8x16xf32, #tpu.memory_space<vmem>>, %arg2: memref<16x128xbf16, #tpu.memory_space<vmem>>, %arg3: memref<1x128xf32, #tpu.memory_space<vmem>>, %arg4: memref<128x128xbf16, #tpu.memory_space<vmem>>, %arg5: memref<1x128xf32, #tpu.memory_space<vmem>>, %arg6: memref<8x128xf32, #tpu.memory_space<vmem>>) attributes {dimension_semantics = [#tpu.dimension_semantics<parallel>], iteration_bounds = array<i64: 1>, scalar_prefetch = 0 : i64, scratch_operands = 0 : i64, tpu.core_type = #tpu.core_type<tc>, window_params = [{transform_indices = @transform_0, window_bounds = array<i64: 8, 16>}, {pipeline_mode = #tpu.pipeline_mode<synchronous>, transform_indices = @transform_1, window_bounds = array<i64: 16, 128>}, {pipeline_mode = #tpu.pipeline_mode<synchronous>, transform_indices = @transform_2, window_bounds = array<i64: 1, 128>}, {pipeline_mode = #tpu.pipeline_mode<synchronous>, transform_indices = @transform_3, window_bounds = array<i64: 128, 128>}, {pipeline_mode = #tpu.pipeline_mode<synchronous>, transform_indices = @transform_4, window_bounds = array<i64: 1, 128>}, {transform_indices = @transform_5, window_bounds = array<i64: 8, 128>}]} {
    %c0 = arith.constant 0 : index
    %c0_0 = arith.constant 0 : index
    %0 = vector.load %arg1[%c0, %c0_0] : memref<8x16xf32, #tpu.memory_space<vmem>>, vector<8x16xf32>
    %1 = arith.truncf %0 : vector<8x16xf32> to vector<8x16xbf16>
    %c0_1 = arith.constant 0 : index
    %c0_2 = arith.constant 0 : index
    %2 = vector.load %arg2[%c0_1, %c0_2] : memref<16x128xbf16, #tpu.memory_space<vmem>>, vector<16x128xbf16>
    %cst = arith.constant dense<0.000000e+00> : vector<8x128xf32>
    %3 = tpu.matmul %1, %2, %cst {dimension_numbers = #tpu.dot_dimension_numbers<[1], [0], [0], [1], [0, 0, 1, 1], [], []>} : vector<8x16xbf16>, vector<16x128xbf16>, vector<8x128xf32> -> vector<8x128xf32>
    %c0_3 = arith.constant 0 : index
    %c0_4 = arith.constant 0 : index
    %4 = vector.load %arg3[%c0_3, %c0_4] : memref<1x128xf32, #tpu.memory_space<vmem>>, vector<1x128xf32>
    %5 = vector.broadcast %4 : vector<1x128xf32> to vector<8x128xf32>
    %6 = arith.addf %3, %5 : vector<8x128xf32>
    %cst_5 = arith.constant 0.000000e+00 : f32
    %7 = vector.broadcast %cst_5 : f32 to vector<8x128xf32>
    %8 = arith.maximumf %6, %7 : vector<8x128xf32>
    %9 = arith.truncf %8 : vector<8x128xf32> to vector<8x128xbf16>
    %c0_6 = arith.constant 0 : index
    %c0_7 = arith.constant 0 : index
    %10 = vector.load %arg4[%c0_6, %c0_7] : memref<128x128xbf16, #tpu.memory_space<vmem>>, vector<128x128xbf16>
    %cst_8 = arith.constant dense<0.000000e+00> : vector<8x128xf32>
    %11 = tpu.matmul %9, %10, %cst_8 {dimension_numbers = #tpu.dot_dimension_numbers<[1], [0], [0], [1], [0, 0, 1, 1], [], []>} : vector<8x128xbf16>, vector<128x128xbf16>, vector<8x128xf32> -> vector<8x128xf32>
    %c0_9 = arith.constant 0 : index
    %c0_10 = arith.constant 0 : index
    %12 = vector.load %arg5[%c0_9, %c0_10] : memref<1x128xf32, #tpu.memory_space<vmem>>, vector<1x128xf32>
    %13 = vector.broadcast %12 : vector<1x128xf32> to vector<8x128xf32>
    %14 = arith.addf %11, %13 : vector<8x128xf32>
    %c0_11 = arith.constant 0 : index
    %c0_12 = arith.constant 0 : index
    %15 = vector.load %arg6[%c0_11, %c0_12] : memref<8x128xf32, #tpu.memory_space<vmem>>, vector<8x128xf32>
    tpu.vector_store %arg6[%c0_11, %c0_12], %14 {strides = array<i32>} : memref<8x128xf32, #tpu.memory_space<vmem>>, vector<8x128xf32>,
    return
  }
  func.func @transform_0(%arg0: i32) -> (i32, i32) {
    %c0_i32 = arith.constant 0 : i32
    %c0_i32_0 = arith.constant 0 : i32
    return %arg0, %c0_i32 : i32, i32
  }
  func.func @transform_1(%arg0: i32) -> (i32, i32) {
    %c0_i32 = arith.constant 0 : i32
    %c0_i32_0 = arith.constant 0 : i32
    %c0_i32_1 = arith.constant 0 : i32
    return %c0_i32, %c0_i32_0 : i32, i32
  }
  func.func @transform_2(%arg0: i32) -> (i32, i32) {
    %c0_i32 = arith.constant 0 : i32
    %c0_i32_0 = arith.constant 0 : i32
    %c0_i32_1 = arith.constant 0 : i32
    return %c0_i32, %c0_i32_0 : i32, i32
  }
  func.func @transform_3(%arg0: i32) -> (i32, i32) {
    %c0_i32 = arith.constant 0 : i32
    %c0_i32_0 = arith.constant 0 : i32
    %c0_i32_1 = arith.constant 0 : i32
    return %c0_i32, %c0_i32_0 : i32, i32
  }
  func.func @transform_4(%arg0: i32) -> (i32, i32) {
    %c0_i32 = arith.constant 0 : i32
    %c0_i32_0 = arith.constant 0 : i32
    %c0_i32_1 = arith.constant 0 : i32
    return %c0_i32, %c0_i32_0 : i32, i32
  }
  func.func @transform_5(%arg0: i32) -> (i32, i32) {
    %c0_i32 = arith.constant 0 : i32
    %c0_i32_0 = arith.constant 0 : i32
    return %arg0, %c0_i32 : i32, i32
  }
}

</mosaic_0001>

<bundles_post_ra>
// kernel: tpu_custom_call.1
= control target key start
LH: loop header
LB: loop body
LE: loop exit
PB: predicated region body
PF: predicated region fallthrough
CT: control target
= control target key end

     0   :  { %10 = vsyncpa [#allocation3], 0  ;;  %s410_s0 = inlined_call_operand.hbm [shape: f32[8,16], index: 0, kind: input, shape index: {}]   ;;  %s411_s1 = inlined_call_operand.hbm [shape: bf16[16,128], index: 1, kind: input, shape index: {}]   ;;  %s412_s2 = inlined_call_operand.vmem [shape: f32[1,128], index: 2, kind: input, shape index: {}]   ;;  %s413_s3 = inlined_call_operand.hbm [shape: bf16[128,128], index: 3, kind: input, shape index: {}]   ;;  %s414_s4 = inlined_call_operand.vmem [shape: f32[1,128], index: 4, kind: input, shape index: {}]   ;;  %s415_s5 = inlined_call_operand.hbm [shape: f32[8,128], index: 5, kind: output, shape index: {}]  }
   0x1   :  { %11 = vsyncpa [#allocation6], 0  ;;  %s28_s20 = sshll.u32 %s411_s1, 4  ;;  %s29_s20 = int_to_ptr.hbm [resolvable:$true] %s28_s20 }
   0x2   :  { %12 = vsyncpa [#allocation4], 0  ;;  %s356_s21 = smov [#allocation5]   ;;  %s18_s25 = sshll.u32 %s410_s0, 4  ;;  %s19_s25 = int_to_ptr.hbm [resolvable:$true] %s18_s25 }
   0x3   :  { %s30_s22 = sshll.u32 %s356_s21, 4  ;;  %s357_s26 = smov 64   ;;  %s31_s22 = int_to_ptr.vmem [resolvable:$true] %s30_s22 }
   0x4   :  { %s358_s27 = smov 4   ;;  %s359_s28 = smov [#allocation2]  }
   0x5   :  { %36 = dma.hbm_to_vmem [thread:$0]  %s29_s20, 128, %s31_s22, [#allocation6], %s357_s26, %s357_s26, %s358_s27  }
   0x6   :  { %s20_s29 = sshll.u32 %s359_s28, 4  ;;  %s43_s7 = sshll.u32 %s413_s3, 4  ;;  %s21_s29 = int_to_ptr.vmem [resolvable:$true] %s20_s29  ;;  %s44_s7 = int_to_ptr.hbm [resolvable:$true] %s43_s7 }
   0x7   :  { %23 = dma.hbm_to_vmem [thread:$0]  %s19_s25, 128, %s21_s29, [#allocation3]  }
   0x8   :  { %s360_s1 = smov [#allocation7]  }
   0x9   :  { %s45_s8 = sshll.u32 %s360_s1, 4  ;;  %s46_s8 = int_to_ptr.vmem [resolvable:$true] %s45_s8 }
   0xa   :  { %51 = dma.hbm_to_vmem [thread:$0]  %s44_s7, 1024, %s46_s8, [#allocation6], %s357_s26, %s357_s26, %s358_s27  }
   0xb   :  { %350 = dma.done.wait [#allocation3], 128  }
   0xc   :  { %351 = vsyncadd [#allocation3], 4294967168 }
   0xd   :  { %352 = dma.done.wait [#allocation6], 1152  }
   0xe   :  { %353 = vsyncadd [#allocation6], 4294966144  ;;  %v237_v0 = vld [vmem:[#allocation5] sm:$0xff]  ;;  %v67_v1 = vld [vmem:[#allocation2] sm:$0xff]  ;;  %vm81_vm0 = vcmask 130048   ;;  %s361_s11 = smov [#allocation8]  }
   0xf   :  { %v245_v2 = vld [vmem:[#allocation7 + $0x38] sm:$0xff]  ;;  %v68_v3 = vpack.c.bf16 %v67_v1, %v67_v1  ;;  %92 = vmatpush.bf16.msra.mxu0 %v237_v0  ;;  %v244_v4 = vld [vmem:[#allocation7 + $0x30] sm:$0xff]  ;;  %v243_v5 = vld [vmem:[#allocation7 + $0x28] sm:$0xff]  ;;  %s187_s12 = sshll.u32 %s361_s11, 4  ;;  %s189_s15 = sshll.u32 %s415_s5, 4  ;;  %s188_s12 = int_to_ptr.vmem [resolvable:$true] %s187_s12  ;;  %s190_s15 = int_to_ptr.hbm [resolvable:$true] %s189_s15 }
  0x10   :  { %168 = vmatpush.bf16.msra.mxu1 %v245_v2  ;;  %v242_v6 = vld [vmem:[#allocation7 + $0x20] sm:$0xff]  ;;  %v241_v7 = vld [vmem:[#allocation7 + $0x18] sm:$0xff]  ;;  %v240_v8 = vld [vmem:[#allocation7 + $0x10] sm:$0xff] }
  0x11   :  { %v239_v9 = vld [vmem:[#allocation7 + $0x8] sm:$0xff]  ;;  %v238_v10 = vld [vmem:[#allocation7] sm:$0xff]  ;;  %v252_v11 = vld [vmem:[%s412_s2] ss:$0 sm:$0xff] }
  0x12   :  { %204 = vmatmul.msk.bf16.vlgmr.msra.gmra.mxu0 %vm81_vm0, %v68_v3  ;;  %v253_v17 = vld [vmem:[%s414_s4] ss:$0 sm:$0xff] }
  0x14   :  { %169 = vmatpush.bf16.msra.mxu1 %v244_v4 }
  0x18   :  { %170 = vmatpush.bf16.msra.mxu1 %v243_v5 }
  0x1c   :  { %171 = vmatpush.bf16.msra.mxu1 %v242_v6 }
  0x20   :  { %172 = vmatpush.bf16.msra.mxu1 %v241_v7 }
  0x24   :  { %173 = vmatpush.bf16.msra.mxu1 %v240_v8 }
  0x28   :  { %174 = vmatpush.bf16.msra.mxu1 %v239_v9 }
  0x2c   :  { %175 = vmatpush.bf16.msra.mxu1 %v238_v10 }
  0x8f   :  { %v94_v12 = vpop.f32.mrf.mxu0 }
  0x90   :  { %v95_v13 = vadd.f32 %v252_v11, %v94_v12 }
  0x92   :  { %v98_v14 = vmax.f32 %v95_v13, 0.0 }
  0x94   :  { %v99_v15 = vpack.c.bf16 %v98_v14, %v98_v14 }
  0x96   :  { %176 = vmatmul.bf16.vlgmr.msra.gmra.mxu1 %v99_v15 }
  0x97   :  { %v96_v16 = vpop.f32.mrf.mxu0 }
 0x113   :  { %v177_v18 = vpop.f32.mrf.mxu1 }
 0x114   :  { %v178_v19 = vadd.f32 %v253_v17, %v177_v18 }
 0x116   :  { %181 = vst [vmem:[#allocation8] sm:$0xff] %v178_v19 }
 0x117   :  { %192 = dma.vmem_to_hbm [thread:$0]  %s188_s12, 128, %s190_s15, [#allocation4]  }
 0x11b   :  { %v179_v20 = vpop.f32.mrf.mxu1 }
 0x11c   :  { %354 = dma.done.wait [#allocation4], 128  }
 0x11d   :  { %355 = vsyncadd [#allocation4], 4294967168 }
 0x11e   :  { %197 = vsyncpa [#allocation3], 1 }
 0x11f   :  { %198 = vsyncpa [#allocation6], 1 }
 0x120   :  { %199 = vsyncpa [#allocation4], 1 }

</bundles_post_ra>
